<compile_context>
chip_gen: v5e
topology: v5e:2x2
jax: 0.10.0
libtpu: 0.0.40
codegen_flags: <defaults>
</compile_context>

<pallas_src>
import jax
import jax.numpy as jnp
from jax.experimental import pallas as pl
from jax.experimental.pallas import tpu as pltpu

_LANE = 128


def _round_up(x, m):
    return ((x + m - 1) // m) * m


def _cdiv(a, b):
    return -(-a // b)


def _critic_kernel(x_ref, w1_ref, b1_ref, w2_ref, b2_ref, w3_ref, b3_ref, o_ref):
    # Layer 1: [H, D] @ [D, TB] -> [H, TB]   (MXU, f32 accumulate)
    h1 = jnp.dot(w1_ref[...], x_ref[...], preferred_element_type=jnp.float32)
    h1 = jnp.maximum(h1 + b1_ref[...], 0.0)                      # f32 VPU
    # Layer 2: [H, H] @ [H, TB] -> [H, TB]   (MXU; cast activation to W dtype)
    h2 = jnp.dot(w2_ref[...], h1.astype(w2_ref.dtype),
                 preferred_element_type=jnp.float32)
    h2 = jnp.maximum(h2 + b2_ref[...], 0.0)                      # f32 VPU
    # Layer 3: [1, H] @ [H, TB] -> [1, TB]   (one MXU push per N tile)
    v = jnp.dot(w3_ref[...], h2, preferred_element_type=jnp.float32) + b3_ref[...]
    o_ref[...] = v.astype(o_ref.dtype)


def risk_averse_critic_forward(state, params, *, max_batch_tile=4096,
                               matmul_dtype=jnp.float32):
    """state: [B, state_dim] float32 -> [B] float32, V(s).

    params are PyTorch-native: (w1[H,D], b1[H], w2[H,H], b2[H], w3[1,H], b3[1]).
    """
    w1, b1, w2, b2, w3, b3 = params
    B, D = state.shape
    H = w1.shape[0]

    # ---- batch tiling (batch lives on lanes in feature-major layout) ----
    n_tiles = max(1, _cdiv(B, max(max_batch_tile, _LANE)))
    if B >= 2 * _LANE and n_tiles < 2:
        n_tiles = 2                      # keep both v7x TensorCores busy
    TB = _round_up(_cdiv(B, n_tiles), _LANE)
    B_pad = n_tiles * TB                 # pads at most ~1 extra 128-lane tile

    # One fused HBM copy: pad batch (rows) -> transpose to [D, B_pad] -> cast.
    x_fm = jnp.pad(state, ((0, B_pad - B), (0, 0))).T.astype(matmul_dtype)

    # Weights in [out, in] form; biases as column vectors for lane broadcast.
    w1_c = w1.astype(matmul_dtype)                     # [H, D]
    w2_c = w2.astype(matmul_dtype)                     # [H, H]
    b1_c = b1.reshape(H, 1).astype(jnp.float32)        # [H, 1]
    b2_c = b2.reshape(H, 1).astype(jnp.float32)        # [H, 1]
    w3_c = w3.reshape(1, H).astype(jnp.float32)        # [1, H]
    b3_c = b3.reshape(1, 1).astype(jnp.float32)        # [1, 1]

    resident = lambda i: (0, 0)          # DMA'd once, stays in VMEM

    itm = jnp.dtype(matmul_dtype).itemsize
    flops = 2 * B_pad * (D * H + H * H + H)
    bytes_accessed = (B_pad * D * itm + B_pad * 4
                      + (D * H + H * H) * itm + 4 * (2 * H + H + 1))

    out = pl.pallas_call(
        _critic_kernel,
        out_shape=jax.ShapeDtypeStruct((1, B_pad), jnp.float32),
        grid=(n_tiles,),
        in_specs=[
            pl.BlockSpec((D, TB), lambda i: (0, i)),   # state: streamed tiles
            pl.BlockSpec((H, D), resident),            # w1
            pl.BlockSpec((H, 1), resident),            # b1
            pl.BlockSpec((H, H), resident),            # w2
            pl.BlockSpec((H, 1), resident),            # b2
            pl.BlockSpec((1, H), resident),            # w3
            pl.BlockSpec((1, 1), resident),            # b3
        ],
        out_specs=pl.BlockSpec((1, TB), lambda i: (0, i)),   # lane-dense row
        compiler_params=pltpu.CompilerParams(
            dimension_semantics=("parallel",),   # megacore split on v7x
            vmem_limit_bytes=32 << 20,
        ),
        cost_estimate=pl.CostEstimate(
            flops=flops, transcendentals=0, bytes_accessed=bytes_accessed),
    )(x_fm, w1_c, b1_c, w2_c, b2_c, w3_c, b3_c)

    # PyTorch: x.squeeze(-1) -> [batch_size]; drop lane padding.
    return out[0, :B]


def init_params(key, state_dim, hidden_size=64):
    """Deterministic init mimicking nn.Linear (uniform +/- 1/sqrt(fan_in)),
    PyTorch-native orientation: weight [out, in], bias [out]."""
    ks = jax.random.split(key, 6)

    def linear(kw, kb, fan_in, fan_out):
        bound = 1.0 / jnp.sqrt(fan_in)
        w = jax.random.uniform(kw, (fan_out, fan_in), jnp.float32, -bound, bound)
        b = jax.random.uniform(kb, (fan_out,), jnp.float32, -bound, bound)
        return w, b

    w1, b1 = linear(ks[0], ks[1], state_dim, hidden_size)
    w2, b2 = linear(ks[2], ks[3], hidden_size, hidden_size)
    w3, b3 = linear(ks[4], ks[5], hidden_size, 1)
    return (w1, b1, w2, b2, w3, b3)


def reference_forward(state, params):
    w1, b1, w2, b2, w3, b3 = params
    h1 = jnp.maximum(state @ w1.T + b1, 0.0)
    h2 = jnp.maximum(h1 @ w2.T + b2, 0.0)
    return (h2 @ w3.T + b3)[:, 0]


if __name__ == "__main__":
    key = jax.random.PRNGKey(0)
    k_params, k_s1, k_s2, k_s3 = jax.random.split(key, 4)

    state_dim = 32      # flattened (z, m)
    hidden_size = 64
    params = init_params(k_params, state_dim, hidden_size)

    # 1) Small, single-tile case (f32 matmuls, strict tolerance).
    state = jax.random.normal(k_s1, (8, state_dim), dtype=jnp.float32)
    v = jax.block_until_ready(risk_averse_critic_forward(state, params))
    v_ref = reference_forward(state, params)
    assert v.shape == (8,), v.shape
    assert jnp.allclose(v, v_ref, atol=1e-5, rtol=1e-5)

    # 2) Multi-tile case with a ragged batch (exercises lane padding + grid).
    state2 = jax.random.normal(k_s2, (300, state_dim), dtype=jnp.float32)
    v2 = jax.block_until_ready(
        risk_averse_critic_forward(state2, params, max_batch_tile=128))
    v2_ref = reference_forward(state2, params)
    assert v2.shape == (300,), v2.shape
    assert jnp.allclose(v2, v2_ref, atol=1e-5, rtol=1e-5)

    # 3) bf16 MXU operands + forced 2-step grid (v7x megacore path),
    #    loose tolerance because of bf16 operand rounding.
    state3 = jax.random.normal(k_s3, (256, state_dim), dtype=jnp.float32)
    v3 = jax.block_until_ready(
        risk_averse_critic_forward(state3, params, matmul_dtype=jnp.bfloat16))
    v3_ref = reference_forward(state3, params)
    assert v3.shape == (256,), v3.shape
    assert jnp.allclose(v3, v3_ref, atol=2e-2, rtol=2e-2)

    print("KERNEL_OK")
</pallas_src>

<mosaic_0001>
module attributes {stable_mosaic.version = 11 : i64} {
  func.func @_critic_kernel(%arg0: i32, %arg1: memref<32x128xf32, #tpu.memory_space<vmem>>, %arg2: memref<64x32xf32, #tpu.memory_space<vmem>>, %arg3: memref<64x1xf32, #tpu.memory_space<vmem>>, %arg4: memref<64x64xf32, #tpu.memory_space<vmem>>, %arg5: memref<64x1xf32, #tpu.memory_space<vmem>>, %arg6: memref<1x64xf32, #tpu.memory_space<vmem>>, %arg7: memref<1x1xf32, #tpu.memory_space<vmem>>, %arg8: memref<1x128xf32, #tpu.memory_space<vmem>>) attributes {dimension_semantics = [#tpu.dimension_semantics<parallel>], iteration_bounds = array<i64: 1>, scalar_prefetch = 0 : i64, scratch_operands = 0 : i64, tpu.core_type = #tpu.core_type<tc>, window_params = [{transform_indices = @transform_0, window_bounds = array<i64: 32, 128>}, {pipeline_mode = #tpu.pipeline_mode<synchronous>, transform_indices = @transform_1, window_bounds = array<i64: 64, 32>}, {pipeline_mode = #tpu.pipeline_mode<synchronous>, transform_indices = @transform_2, window_bounds = array<i64: 64, 1>}, {pipeline_mode = #tpu.pipeline_mode<synchronous>, transform_indices = @transform_3, window_bounds = array<i64: 64, 64>}, {pipeline_mode = #tpu.pipeline_mode<synchronous>, transform_indices = @transform_4, window_bounds = array<i64: 64, 1>}, {pipeline_mode = #tpu.pipeline_mode<synchronous>, transform_indices = @transform_5, window_bounds = array<i64: 1, 64>}, {pipeline_mode = #tpu.pipeline_mode<synchronous>, transform_indices = @transform_6, window_bounds = array<i64: 1, 1>}, {transform_indices = @transform_7, window_bounds = array<i64: 1, 128>}]} {
    %c0 = arith.constant 0 : index
    %c0_0 = arith.constant 0 : index
    %0 = vector.load %arg2[%c0, %c0_0] : memref<64x32xf32, #tpu.memory_space<vmem>>, vector<64x32xf32>
    %c0_1 = arith.constant 0 : index
    %c0_2 = arith.constant 0 : index
    %1 = vector.load %arg1[%c0_1, %c0_2] : memref<32x128xf32, #tpu.memory_space<vmem>>, vector<32x128xf32>
    %cst = arith.constant dense<0.000000e+00> : vector<64x128xf32>
    %2 = tpu.matmul %0, %1, %cst {dimension_numbers = #tpu.dot_dimension_numbers<[1], [0], [0], [1], [0, 0, 1, 1], [], []>} : vector<64x32xf32>, vector<32x128xf32>, vector<64x128xf32> -> vector<64x128xf32>
    %c0_3 = arith.constant 0 : index
    %c0_4 = arith.constant 0 : index
    %3 = vector.load %arg3[%c0_3, %c0_4] : memref<64x1xf32, #tpu.memory_space<vmem>>, vector<64x1xf32>
    %4 = vector.broadcast %3 : vector<64x1xf32> to vector<64x128xf32>
    %5 = arith.addf %2, %4 : vector<64x128xf32>
    %cst_5 = arith.constant 0.000000e+00 : f32
    %6 = vector.broadcast %cst_5 : f32 to vector<64x128xf32>
    %7 = arith.maximumf %5, %6 : vector<64x128xf32>
    %c0_6 = arith.constant 0 : index
    %c0_7 = arith.constant 0 : index
    %8 = vector.load %arg4[%c0_6, %c0_7] : memref<64x64xf32, #tpu.memory_space<vmem>>, vector<64x64xf32>
    %cst_8 = arith.constant dense<0.000000e+00> : vector<64x128xf32>
    %9 = tpu.matmul %8, %7, %cst_8 {dimension_numbers = #tpu.dot_dimension_numbers<[1], [0], [0], [1], [0, 0, 1, 1], [], []>} : vector<64x64xf32>, vector<64x128xf32>, vector<64x128xf32> -> vector<64x128xf32>
    %c0_9 = arith.constant 0 : index
    %c0_10 = arith.constant 0 : index
    %10 = vector.load %arg5[%c0_9, %c0_10] : memref<64x1xf32, #tpu.memory_space<vmem>>, vector<64x1xf32>
    %11 = vector.broadcast %10 : vector<64x1xf32> to vector<64x128xf32>
    %12 = arith.addf %9, %11 : vector<64x128xf32>
    %cst_11 = arith.constant 0.000000e+00 : f32
    %13 = vector.broadcast %cst_11 : f32 to vector<64x128xf32>
    %14 = arith.maximumf %12, %13 : vector<64x128xf32>
    %c0_12 = arith.constant 0 : index
    %c0_13 = arith.constant 0 : index
    %15 = vector.load %arg6[%c0_12, %c0_13] : memref<1x64xf32, #tpu.memory_space<vmem>>, vector<1x64xf32>
    %cst_14 = arith.constant dense<0.000000e+00> : vector<1x128xf32>
    %16 = tpu.matmul %15, %14, %cst_14 {dimension_numbers = #tpu.dot_dimension_numbers<[1], [0], [0], [1], [0, 0, 1, 1], [], []>} : vector<1x64xf32>, vector<64x128xf32>, vector<1x128xf32> -> vector<1x128xf32>
    %c0_15 = arith.constant 0 : index
    %c0_16 = arith.constant 0 : index
    %17 = vector.load %arg7[%c0_15, %c0_16] : memref<1x1xf32, #tpu.memory_space<vmem>>, vector<1x1xf32>
    %18 = vector.broadcast %17 : vector<1x1xf32> to vector<1x128xf32>
    %19 = arith.addf %16, %18 : vector<1x128xf32>
    %c0_17 = arith.constant 0 : index
    %c0_18 = arith.constant 0 : index
    %20 = vector.load %arg8[%c0_17, %c0_18] : memref<1x128xf32, #tpu.memory_space<vmem>>, vector<1x128xf32>
    tpu.vector_store %arg8[%c0_17, %c0_18], %19 {strides = array<i32>} : memref<1x128xf32, #tpu.memory_space<vmem>>, vector<1x128xf32>,
    return
  }
  func.func @transform_0(%arg0: i32) -> (i32, i32) {
    %c0_i32 = arith.constant 0 : i32
    %c0_i32_0 = arith.constant 0 : i32
    return %c0_i32, %arg0 : i32, i32
  }
  func.func @transform_1(%arg0: i32) -> (i32, i32) {
    %c0_i32 = arith.constant 0 : i32
    %c0_i32_0 = arith.constant 0 : i32
    %c0_i32_1 = arith.constant 0 : i32
    return %c0_i32, %c0_i32_0 : i32, i32
  }
  func.func @transform_2(%arg0: i32) -> (i32, i32) {
    %c0_i32 = arith.constant 0 : i32
    %c0_i32_0 = arith.constant 0 : i32
    %c0_i32_1 = arith.constant 0 : i32
    return %c0_i32, %c0_i32_0 : i32, i32
  }
  func.func @transform_3(%arg0: i32) -> (i32, i32) {
    %c0_i32 = arith.constant 0 : i32
    %c0_i32_0 = arith.constant 0 : i32
    %c0_i32_1 = arith.constant 0 : i32
    return %c0_i32, %c0_i32_0 : i32, i32
  }
  func.func @transform_4(%arg0: i32) -> (i32, i32) {
    %c0_i32 = arith.constant 0 : i32
    %c0_i32_0 = arith.constant 0 : i32
    %c0_i32_1 = arith.constant 0 : i32
    return %c0_i32, %c0_i32_0 : i32, i32
  }
  func.func @transform_5(%arg0: i32) -> (i32, i32) {
    %c0_i32 = arith.constant 0 : i32
    %c0_i32_0 = arith.constant 0 : i32
    %c0_i32_1 = arith.constant 0 : i32
    return %c0_i32, %c0_i32_0 : i32, i32
  }
  func.func @transform_6(%arg0: i32) -> (i32, i32) {
    %c0_i32 = arith.constant 0 : i32
    %c0_i32_0 = arith.constant 0 : i32
    %c0_i32_1 = arith.constant 0 : i32
    return %c0_i32, %c0_i32_0 : i32, i32
  }
  func.func @transform_7(%arg0: i32) -> (i32, i32) {
    %c0_i32 = arith.constant 0 : i32
    %c0_i32_0 = arith.constant 0 : i32
    return %c0_i32, %arg0 : i32, i32
  }
}

</mosaic_0001>

<bundles_post_ra>
// kernel: tpu_custom_call.1
= control target key start
LH: loop header
LB: loop body
LE: loop exit
PB: predicated region body
PF: predicated region fallthrough
CT: control target
= control target key end

     0   :  { %s577_s0 = inlined_call_operand.vmem [shape: f32[32,128], index: 0, kind: input, shape index: {}]   ;;  %s578_s1 = inlined_call_operand.vmem [shape: f32[64,32], index: 1, kind: input, shape index: {}]   ;;  %s579_s2 = inlined_call_operand.vmem [shape: f32[64,1], index: 2, kind: input, shape index: {}]   ;;  %s580_s3 = inlined_call_operand.vmem [shape: f32[64,64], index: 3, kind: input, shape index: {}]   ;;  %s581_s4 = inlined_call_operand.vmem [shape: f32[64,1], index: 4, kind: input, shape index: {}]   ;;  %s582_s5 = inlined_call_operand.vmem [shape: f32[1,64], index: 5, kind: input, shape index: {}]   ;;  %s583_s6 = inlined_call_operand.<no memory space> [shape: f32[1,1], index: 6, kind: input, shape index: {}]   ;;  %s584_s7 = inlined_call_operand.hbm [shape: f32[1,128], index: 7, kind: output, shape index: {}]  }
   0x1   :  { %v12_v0 = vstv %s583_s6 }
   0x2   :  { %13 = vst [vmem:[#allocation2] sm:$0x1] %v12_v0 }
   0x3   :  { %v40_v1 = vld [vmem:[%s577_s0 + $0x18] sm:$0xff]  ;;  %v46_v3 = vld [vmem:[%s579_s2 + $0x28] sm:$0xff]  ;;  %v401_v4 = vmov 0   ;;  %v39_v5 = vld [vmem:[%s577_s0 + $0x10] sm:$0xff]  ;;  %vm89_vm0 = vcmask 261120  }
   0x4   :  { %v48_v2 = vld [vmem:[%s579_s2 + $0x38] sm:$0xff]  ;;  %372 = vset.pattern.permute.xlu0 %v401_v4  ;;  %126 = vmatpush.msra.mxu0 %v40_v1  ;;  %v38_v6 = vld [vmem:[%s577_s0 + $0x8] sm:$0xff]  ;;  %v37_v7 = vld [vmem:[%s577_s0] sm:$0xff] }
   0x5   :  { %358 = vmatpush.msra.mxu2 %v40_v1  ;;  %373 = vset.pattern.permute.xlu1 %v401_v4  ;;  %v29_v8 = vld [vmem:[%s578_s1] sm:$0xff]  ;;  %v34_v9 = vld [vmem:[%s578_s1 + $0x28] sm:$0xff]  ;;  %v44_v10 = vld [vmem:[%s579_s2 + $0x18] sm:$0xff] }
   0x6   :  { %86 = vperm.xlu0 %372, %v48_v2   ;;  %76 = vperm.xlu1 %373, %v46_v3  }
   0x7   :  { %127 = vmatpush.msra.mxu0 %v39_v5  ;;  %359 = vmatpush.msra.mxu2 %v39_v5 }
   0x8   :  { %374 = vset.pattern.permute.xlu2 %v401_v4 }
   0x9   :  { %128 = vmatpush.msra.mxu0 %v38_v6  ;;  %360 = vmatpush.msra.mxu2 %v38_v6 }
   0xa   :  { %14 = vsyncpa [#allocation4], 0  ;;  %v47_v11 = vld [vmem:[%s579_s2 + $0x30] sm:$0xff]  ;;  %v45_v12 = vld [vmem:[%s579_s2 + $0x20] sm:$0xff]  ;;  %66 = vperm.xlu2 %374, %v44_v10   ;;  %vm219_vm1 = vcmask 523264   ;;  %s402_s20 = smov [#allocation3]  }
   0xb   :  { %129 = vmatpush.msra.mxu0 %v37_v7  ;;  %361 = vmatpush.msra.mxu2 %v37_v7  ;;  %v30_v13 = vld [vmem:[%s578_s1 + $0x8] sm:$0xff]  ;;  %v35_v14 = vld [vmem:[%s578_s1 + $0x30] sm:$0xff]  ;;  %v41_v17 = vld [vmem:[%s579_s2] sm:$0xff]  ;;  %s330_s21 = sshll.u32 %s402_s20, 4  ;;  %s332_s24 = sshll.u32 %s584_s7, 4  ;;  %s331_s21 = int_to_ptr.vmem [resolvable:$true] %s330_s21  ;;  %s333_s24 = int_to_ptr.hbm [resolvable:$true] %s332_s24 }
   0xc   :  { %341 = vmatmul.msk.f32.vlgmr.msra.gmra.mxu0 %vm89_vm0, %v29_v8  ;;  %346 = vmatmul.msk.f32.vlgmr.msra.gmra.mxu2 %vm89_vm0, %v34_v9  ;;  %v43_v15 = vld [vmem:[%s579_s2 + $0x10] sm:$0xff]  ;;  %v42_v16 = vld [vmem:[%s579_s2 + $0x8] sm:$0xff]  ;;  %v36_v19 = vld [vmem:[%s578_s1 + $0x38] sm:$0xff] }
   0xd   :  { %v31_v18 = vld [vmem:[%s578_s1 + $0x10] sm:$0xff]  ;;  %v178_v20 = vld [vmem:[%s581_s4 + $0x38] sm:$0xff]  ;;  %v176_v22 = vld [vmem:[%s581_s4 + $0x28] sm:$0xff] }
   0xe   :  { %81 = vperm.xlu0 %372, %v47_v11   ;;  %71 = vperm.xlu1 %373, %v45_v12   ;;  %v177_v21 = vld [vmem:[%s581_s4 + $0x30] sm:$0xff]  ;;  %v32_v23 = vld [vmem:[%s578_s1 + $0x18] sm:$0xff]  ;;  %v175_v24 = vld [vmem:[%s581_s4 + $0x20] sm:$0xff] }
   0xf   :  { %v174_v25 = vld [vmem:[%s581_s4 + $0x18] sm:$0xff]  ;;  %v173_v26 = vld [vmem:[%s581_s4 + $0x10] sm:$0xff]  ;;  %v33_v27 = vld [vmem:[%s578_s1 + $0x20] sm:$0xff] }
  0x10   :  { %v172_v28 = vld [vmem:[%s581_s4 + $0x8] sm:$0xff]  ;;  %v171_v29 = vld [vmem:[%s581_s4] sm:$0xff]  ;;  %v165_v3 = vld [vmem:[%s580_s3 + $0x10] sm:$0xff] }
  0x11   :  { %v294_v30 = vld [vmem:[#allocation2] sm:$0x1]  ;;  %v164_v1 = vld [vmem:[%s580_s3 + $0x8] sm:$0xff]  ;;  %v169_v4 = vld [vmem:[%s580_s3 + $0x30] sm:$0xff] }
  0x12   :  { %61 = vperm.xlu2 %374, %v43_v15   ;;  %v163_v63 = vld [vmem:[%s580_s3] sm:$0xff]  ;;  %v168_v2 = vld [vmem:[%s580_s3 + $0x28] sm:$0xff]  ;;  %v166_v5 = vld [vmem:[%s580_s3 + $0x18] sm:$0xff] }
  0x13   :  { %v167_v0 = vld [vmem:[%s580_s3 + $0x20] sm:$0xff]  ;;  %v170_v6 = vld [vmem:[%s580_s3 + $0x38] sm:$0xff] }
  0x14   :  { %342 = vmatmul.msk.f32.gmra.mxu0 %vm89_vm0, %v30_v13  ;;  %347 = vmatmul.msk.f32.gmra.mxu2 %vm89_vm0, %v35_v14 }
  0x16   :  { %56 = vperm.xlu0 %372, %v42_v16   ;;  %51 = vperm.xlu1 %373, %v41_v17  }
  0x1a   :  { %216 = vperm.xlu2 %374, %v178_v20  }
  0x1c   :  { %343 = vmatmul.msk.f32.gmra.mxu0 %vm89_vm0, %v31_v18  ;;  %348 = vmatmul.msk.f32.gmra.mxu2 %vm89_vm0, %v36_v19 }
  0x1e   :  { %211 = vperm.xlu0 %372, %v177_v21   ;;  %206 = vperm.xlu1 %373, %v176_v22  }
  0x22   :  { %201 = vperm.xlu2 %374, %v175_v24  }
  0x24   :  { %344 = vmatmul.msk.f32.gmra.mxu0 %vm89_vm0, %v32_v23 }
  0x26   :  { %196 = vperm.xlu0 %372, %v174_v25   ;;  %191 = vperm.xlu1 %373, %v173_v26  }
  0x2a   :  { %186 = vperm.xlu2 %374, %v172_v28  }
  0x2c   :  { %345 = vmatmul.msk.f32.gmra.mxu0 %vm89_vm0, %v33_v27 }
  0x2e   :  { %181 = vperm.xlu0 %372, %v171_v29   ;;  %297 = vperm.xlu1 %373, %v294_v30  }
  0x64   :  { %v67_v42 = vpop.permute.xlu2 %66 }
  0x6c   :  { %v62_v52 = vpop.permute.xlu2 %61 }
  0x74   :  { %v217_v11 = vpop.permute.xlu2 %216 }
  0x78   :  { %v87_v34 = vpop.permute.xlu0 %86  ;;  %v77_v36 = vpop.permute.xlu1 %76 }
  0x7c   :  { %v202_v16 = vpop.permute.xlu2 %201 }
  0x80   :  { %v82_v38 = vpop.permute.xlu0 %81  ;;  %v72_v46 = vpop.permute.xlu1 %71 }
  0x88   :  { %v57_v55 = vpop.permute.xlu0 %56  ;;  %v52_v56 = vpop.permute.xlu1 %51 }
  0x89   :  { %v131_v31 = vpop.f32.mrf.mxu0 }
  0x8a   :  { %v132_v59 = vadd.f32 %v131_v31, %v52_v56  ;;  %v187_v31 = vpop.permute.xlu2 %186 }
  0x8c   :  { %v155_v62 = vmax.f32 %v132_v59, 0.0 }
  0x8f   :  { %v146_v32 = vpop.f32.mrf.mxu2 }
  0x90   :  { %v147_v44 = vadd.f32 %v146_v32, %v77_v36  ;;  %v212_v12 = vpop.permute.xlu0 %211  ;;  %v207_v15 = vpop.permute.xlu1 %206 }
  0x91   :  { %v134_v33 = vpop.f32.mrf.mxu0 }
  0x92   :  { %v160_v48 = vmax.f32 %v147_v44, 0.0  ;;  %v135_v57 = vadd.f32 %v134_v33, %v57_v55 }
  0x94   :  { %v156_v61 = vmax.f32 %v135_v57, 0.0 }
  0x97   :  { %v149_v35 = vpop.f32.mrf.mxu2 }
  0x98   :  { %v150_v40 = vadd.f32 %v149_v35, %v82_v38  ;;  %v197_v20 = vpop.permute.xlu0 %196  ;;  %v192_v28 = vpop.permute.xlu1 %191 }
  0x99   :  { %v137_v37 = vpop.f32.mrf.mxu0 }
  0x9a   :  { %v161_v47 = vmax.f32 %v150_v40, 0.0  ;;  %v138_v53 = vadd.f32 %v137_v37, %v62_v52 }
  0x9c   :  { %v157_v60 = vmax.f32 %v138_v53, 0.0 }
  0x9f   :  { %v152_v39 = vpop.f32.mrf.mxu2 }
  0xa0   :  { %v153_v41 = vadd.f32 %v152_v39, %v87_v34  ;;  %v182_v34 = vpop.permute.xlu0 %181  ;;  %v293_v39 = vld [vmem:[%s582_s5] sm:$0x1]  ;;  %v298_v40 = vpop.permute.xlu1 %297 }
  0xa1   :  { %v140_v43 = vpop.f32.mrf.mxu0 }
  0xa2   :  { %v162_v45 = vmax.f32 %v153_v41, 0.0  ;;  %v141_v50 = vadd.f32 %v140_v43, %v67_v42  ;;  %v300_v41 = vperm.slane %v298_v40, 0 }
  0xa4   :  { %252 = vmatpush.msra.mxu1 %v162_v45  ;;  %362 = vmatpush.msra.mxu3 %v162_v45  ;;  %v158_v58 = vmax.f32 %v141_v50, 0.0 }
  0xa6   :  { %253 = vmatpush.msra.mxu1 %v161_v47  ;;  %363 = vmatpush.msra.mxu3 %v161_v47 }
  0xa8   :  { %254 = vmatpush.msra.mxu1 %v160_v48  ;;  %364 = vmatpush.msra.mxu3 %v160_v48 }
  0xa9   :  { %v143_v49 = vpop.f32.mrf.mxu0 }
  0xaa   :  { %v144_v51 = vadd.f32 %v143_v49, %v72_v46 }
  0xac   :  { %v159_v54 = vmax.f32 %v144_v51, 0.0 }
  0xae   :  { %255 = vmatpush.msra.mxu1 %v159_v54  ;;  %365 = vmatpush.msra.mxu3 %v159_v54 }
  0xb0   :  { %256 = vmatpush.msra.mxu1 %v158_v58  ;;  %366 = vmatpush.msra.mxu3 %v158_v58 }
  0xb2   :  { %257 = vmatpush.msra.mxu1 %v157_v60  ;;  %367 = vmatpush.msra.mxu3 %v157_v60 }
  0xb4   :  { %258 = vmatpush.msra.mxu1 %v156_v61  ;;  %368 = vmatpush.msra.mxu3 %v156_v61 }
  0xb6   :  { %259 = vmatpush.msra.mxu1 %v155_v62  ;;  %369 = vmatpush.msra.mxu3 %v155_v62 }
  0xb7   :  { %349 = vmatmul.msk.f32.vlgmr.msra.gmra.mxu1 %vm219_vm1, %v163_v63  ;;  %353 = vmatmul.msk.f32.vlgmr.msra.gmra.mxu3 %vm219_vm1, %v167_v0 }
  0xbf   :  { %350 = vmatmul.msk.f32.gmra.mxu1 %vm219_vm1, %v164_v1  ;;  %354 = vmatmul.msk.f32.gmra.mxu3 %vm219_vm1, %v168_v2 }
  0xc7   :  { %351 = vmatmul.msk.f32.gmra.mxu1 %vm219_vm1, %v165_v3  ;;  %355 = vmatmul.msk.f32.gmra.mxu3 %vm219_vm1, %v169_v4 }
  0xcf   :  { %352 = vmatmul.msk.f32.gmra.mxu1 %vm219_vm1, %v166_v5  ;;  %356 = vmatmul.msk.f32.gmra.mxu3 %vm219_vm1, %v170_v6 }
 0x134   :  { %v261_v7 = vpop.f32.mrf.mxu1 }
 0x135   :  { %v262_v35 = vadd.f32 %v261_v7, %v182_v34 }
 0x137   :  { %v285_v38 = vmax.f32 %v262_v35, 0.0 }
 0x13a   :  { %v273_v8 = vpop.f32.mrf.mxu3 }
 0x13b   :  { %v274_v24 = vadd.f32 %v273_v8, %v202_v16 }
 0x13c   :  { %v264_v9 = vpop.f32.mrf.mxu1 }
 0x13d   :  { %v289_v29 = vmax.f32 %v274_v24, 0.0  ;;  %v265_v32 = vadd.f32 %v264_v9, %v187_v31 }
 0x13f   :  { %v286_v37 = vmax.f32 %v265_v32, 0.0 }
 0x142   :  { %v276_v10 = vpop.f32.mrf.mxu3 }
 0x143   :  { %v277_v21 = vadd.f32 %v276_v10, %v207_v15 }
 0x144   :  { %v267_v14 = vpop.f32.mrf.mxu1 }
 0x145   :  { %v290_v26 = vmax.f32 %v277_v21, 0.0  ;;  %v268_v30 = vadd.f32 %v267_v14, %v192_v28 }
 0x147   :  { %v287_v36 = vmax.f32 %v268_v30, 0.0 }
 0x14a   :  { %v279_v13 = vpop.f32.mrf.mxu3 }
 0x14b   :  { %v280_v18 = vadd.f32 %v279_v13, %v212_v12 }
 0x14c   :  { %v270_v23 = vpop.f32.mrf.mxu1 }
 0x14d   :  { %v291_v25 = vmax.f32 %v280_v18, 0.0  ;;  %v271_v27 = vadd.f32 %v270_v23, %v197_v20 }
 0x14f   :  { %v288_v33 = vmax.f32 %v271_v27, 0.0 }
 0x152   :  { %v282_v17 = vpop.f32.mrf.mxu3 }
 0x153   :  { %v283_v19 = vadd.f32 %v282_v17, %v217_v11 }
 0x155   :  { %v292_v22 = vmax.f32 %v283_v19, 0.0 }
 0x157   :  { %312 = vmatpush.msrb.mxu2 %v292_v22 }
 0x159   :  { %313 = vmatpush.msrb.mxu2 %v291_v25 }
 0x15b   :  { %314 = vmatpush.msrb.mxu2 %v290_v26 }
 0x15d   :  { %315 = vmatpush.msrb.mxu2 %v289_v29 }
 0x15f   :  { %316 = vmatpush.msrb.mxu2 %v288_v33 }
 0x161   :  { %317 = vmatpush.msrb.mxu2 %v287_v36 }
 0x163   :  { %318 = vmatpush.msrb.mxu2 %v286_v37 }
 0x165   :  { %319 = vmatpush.msrb.mxu2 %v285_v38 }
 0x166   :  { %357 = vmatmul.msk.f32.vlgmr.msrb.gmra.mxu2 %vm219_vm1, %v293_v39 }
 0x1e9   :  { %v321_v42 = vpop.f32.mrf.mxu2 }
 0x1ea   :  { %v322_v43 = vadd.f32 %v321_v42, %v300_v41 }
 0x1ec   :  { %324 = vst [vmem:[#allocation3] sm:$0x1] %v322_v43 }
 0x1ed   :  { %335 = dma.vmem_to_hbm [thread:$0]  %s331_s21, 16, %s333_s24, [#allocation4]  }
 0x1ee   :  { %399 = dma.done.wait [#allocation4], 16  }
 0x1ef   :  { %400 = vsyncadd [#allocation4], 4294967280 }
 0x1f0   :  { %340 = vsyncpa [#allocation4], 1 }

</bundles_post_ra>
